<compile_context>
chip_gen: v7x
topology: tpu7x:2x2x1
jax: 0.10.0
libtpu: 0.0.40
codegen_flags: <defaults>
</compile_context>

<pallas_src>
import jax
import jax.numpy as jnp
import numpy as np
from jax import lax
from jax.experimental import pallas as pl
from jax.experimental.pallas import tpu as pltpu


def lstm_pred2_kernel(xw_ref, whh_ref, wout_ref, bout_ref, out_ref, hs_ref):
    # xw_ref : (T, B, 4H)  precomputed input projection + bias, gate order [i,f,o,g]
    # whh_ref: (H, 4H)     W_hh^T, columns permuted to [i,f,o,g]
    # wout_ref: (H, 1), bout_ref: (1, 1)
    # out_ref: (T*B, 1)
    # hs_ref : (T*B, H)    VMEM scratch holding h for every timestep
    T, B, _ = xw_ref.shape
    H = whh_ref.shape[0]

    whh = whh_ref[...]                                   # load once, stays resident

    h = jnp.zeros((B, H), jnp.float32)
    c = jnp.zeros((B, H), jnp.float32)

    for t in range(T):                                   # fully unrolled recurrence
        gates = xw_ref[t] + jnp.dot(h, whh, preferred_element_type=jnp.float32)
        ifo = jax.nn.sigmoid(gates[:, :3 * H])           # one activation for i,f,o
        g = jnp.tanh(gates[:, 3 * H:])                   # one activation for g
        i = ifo[:, 0 * H:1 * H]
        f = ifo[:, 1 * H:2 * H]
        o = ifo[:, 2 * H:3 * H]
        c = f * c + i * g
        h = o * jnp.tanh(c)
        hs_ref[t * B:(t + 1) * B, :] = h                 # static sublane-aligned store

    # Deferred hidden2out: one (T*B, H) @ (H, 1) matmul + a single store.
    out_ref[...] = (jnp.dot(hs_ref[...], wout_ref[...],
                            preferred_element_type=jnp.float32)
                    + bout_ref[...])


def lstm_pred2_forward(seq, params, batchsize):
    """seq: 1-D f32 array of length T*batchsize. Returns (T*batchsize, 1)."""
    w_ih, w_hh, b_ih, b_hh, w_out, b_out = params
    H = w_hh.shape[1]
    B = batchsize
    T = seq.shape[0] // B

    x = seq.reshape(T, B, -1).astype(jnp.float32)        # (T, B, input_size)

    # Permute gate columns [i, f, g, o] -> [i, f, o, g] (sigmoid gates contiguous).
    perm = np.concatenate([np.arange(0, 2 * H),
                           np.arange(3 * H, 4 * H),
                           np.arange(2 * H, 3 * H)])

    # Hoisted input projection + combined bias for all timesteps: (T, B, 4H).
    xw = jnp.einsum("tbi,gi->tbg", x, w_ih.astype(jnp.float32)) \
        + (b_ih + b_hh).astype(jnp.float32)
    xw = xw[:, :, perm]
    whh_t = w_hh.T[:, perm].astype(jnp.float32)          # (H, 4H), permuted
    wout_t = w_out.T.astype(jnp.float32)                 # (H, 1)
    bout = b_out.reshape(1, 1).astype(jnp.float32)       # (1, 1)

    out = pl.pallas_call(
        lstm_pred2_kernel,
        out_shape=jax.ShapeDtypeStruct((T * B, 1), jnp.float32),
        grid_spec=pltpu.PrefetchScalarGridSpec(
            num_scalar_prefetch=0,
            grid=(1,),                                   # single invocation
            in_specs=[
                pl.BlockSpec((T, B, 4 * H), lambda i: (0, 0, 0)),  # xw (whole)
                pl.BlockSpec((H, 4 * H), lambda i: (0, 0)),        # W_hh^T
                pl.BlockSpec((H, 1), lambda i: (0, 0)),            # W_out^T
                pl.BlockSpec((1, 1), lambda i: (0, 0)),            # b_out
            ],
            out_specs=pl.BlockSpec((T * B, 1), lambda i: (0, 0)),
            scratch_shapes=[
                pltpu.VMEM((T * B, H), jnp.float32),     # all hidden states
            ],
        ),
        compiler_params=pltpu.CompilerParams(
            dimension_semantics=("arbitrary",)),
    )(xw, whh_t, wout_t, bout)

    return out


def lstm_pred2_reference(seq, params, batchsize):
    """Pure-JAX reference (lax.scan), PyTorch nn.LSTM semantics."""
    w_ih, w_hh, b_ih, b_hh, w_out, b_out = params
    H = w_hh.shape[1]
    T = seq.shape[0] // batchsize
    B = batchsize
    x = seq.reshape(T, B, 1).astype(jnp.float32)

    def step(carry, x_t):
        h, c = carry
        gates = x_t @ w_ih.T + h @ w_hh.T + b_ih + b_hh
        i = jax.nn.sigmoid(gates[:, 0 * H:1 * H])
        f = jax.nn.sigmoid(gates[:, 1 * H:2 * H])
        g = jnp.tanh(gates[:, 2 * H:3 * H])
        o = jax.nn.sigmoid(gates[:, 3 * H:4 * H])
        c_new = f * c + i * g
        h_new = o * jnp.tanh(c_new)
        return (h_new, c_new), h_new

    h0 = jnp.zeros((B, H), jnp.float32)
    c0 = jnp.zeros((B, H), jnp.float32)
    _, hs = lax.scan(step, (h0, c0), x)            # (T, B, H)
    out = hs.reshape(T * B, H) @ w_out.T + b_out   # (T*B, 1)
    return out


def init_params(key, input_size, hidden_dim):
    """Deterministic PyTorch-style init: U(-1/sqrt(H), 1/sqrt(H))."""
    H = hidden_dim
    k = 1.0 / np.sqrt(H)
    ks = jax.random.split(key, 6)
    w_ih = jax.random.uniform(ks[0], (4 * H, input_size), jnp.float32, -k, k)
    w_hh = jax.random.uniform(ks[1], (4 * H, H), jnp.float32, -k, k)
    b_ih = jax.random.uniform(ks[2], (4 * H,), jnp.float32, -k, k)
    b_hh = jax.random.uniform(ks[3], (4 * H,), jnp.float32, -k, k)
    w_out = jax.random.uniform(ks[4], (1, H), jnp.float32, -k, k)
    b_out = jax.random.uniform(ks[5], (1,), jnp.float32, -k, k)
    return (w_ih, w_hh, b_ih, b_hh, w_out, b_out)


if __name__ == "__main__":
    # Module config: LSTMpred2(input_size=1, hidden_dim=32, batchsize=8)
    # nn.LSTM dropout=0.5 is a no-op for num_layers=1, so it is omitted.
    input_size = 1       # forward reshapes seq to (T, batch, 1)
    hidden_dim = 32
    batchsize = 8
    T = 8

    key = jax.random.PRNGKey(0)
    kp, kx = jax.random.split(key)
    params = init_params(kp, input_size, hidden_dim)
    seq = jax.random.normal(kx, (T * batchsize,), jnp.float32)

    out = lstm_pred2_forward(seq, params, batchsize)
    out = jax.block_until_ready(out)

    ref = lstm_pred2_reference(seq, params, batchsize)
    ref = jax.block_until_ready(ref)

    assert out.shape == (T * batchsize, 1)
    np.testing.assert_allclose(np.asarray(out), np.asarray(ref),
                               rtol=1e-3, atol=1e-3)
    print("KERNEL_OK")
</pallas_src>

<mosaic_0001>
module attributes {stable_mosaic.version = 11 : i64} {
  func.func @lstm_pred2_kernel(%arg0: i32, %arg1: memref<8x8x128xf32, #tpu.memory_space<vmem>>, %arg2: memref<32x128xf32, #tpu.memory_space<vmem>>, %arg3: memref<32x1xf32, #tpu.memory_space<vmem>>, %arg4: memref<1x1xf32, #tpu.memory_space<vmem>>, %arg5: memref<64x1xf32, #tpu.memory_space<vmem>>, %arg6: memref<64x32xf32, #tpu.memory_space<vmem>>) attributes {dimension_semantics = [#tpu.dimension_semantics<arbitrary>], iteration_bounds = array<i64: 1>, scalar_prefetch = 0 : i64, scratch_operands = 1 : i64, tpu.core_type = #tpu.core_type<tc>, window_params = [{pipeline_mode = #tpu.pipeline_mode<synchronous>, transform_indices = @transform_0, window_bounds = array<i64: 8, 8, 128>}, {pipeline_mode = #tpu.pipeline_mode<synchronous>, transform_indices = @transform_1, window_bounds = array<i64: 32, 128>}, {pipeline_mode = #tpu.pipeline_mode<synchronous>, transform_indices = @transform_2, window_bounds = array<i64: 32, 1>}, {pipeline_mode = #tpu.pipeline_mode<synchronous>, transform_indices = @transform_3, window_bounds = array<i64: 1, 1>}, {pipeline_mode = #tpu.pipeline_mode<synchronous>, transform_indices = @transform_4, window_bounds = array<i64: 64, 1>}]} {
    %c0 = arith.constant 0 : index
    %c0_0 = arith.constant 0 : index
    %0 = vector.load %arg2[%c0, %c0_0] : memref<32x128xf32, #tpu.memory_space<vmem>>, vector<32x128xf32>
    %cst = arith.constant 0.000000e+00 : f32
    %1 = vector.broadcast %cst : f32 to vector<8x32xf32>
    %cst_1 = arith.constant 0.000000e+00 : f32
    %2 = vector.broadcast %cst_1 : f32 to vector<8x32xf32>
    %c0_2 = arith.constant 0 : index
    %c0_3 = arith.constant 0 : index
    %c0_4 = arith.constant 0 : index
    %3 = vector.load %arg1[%c0_2, %c0_3, %c0_4] : memref<8x8x128xf32, #tpu.memory_space<vmem>>, vector<1x8x128xf32>
    %4 = vector.shape_cast %3 : vector<1x8x128xf32> to vector<8x128xf32>
    %cst_5 = arith.constant dense<0.000000e+00> : vector<8x128xf32>
    %5 = tpu.matmul %1, %0, %cst_5 {dimension_numbers = #tpu.dot_dimension_numbers<[1], [0], [0], [1], [0, 0, 1, 1], [], []>} : vector<8x32xf32>, vector<32x128xf32>, vector<8x128xf32> -> vector<8x128xf32>
    %6 = arith.addf %4, %5 : vector<8x128xf32>
    %7 = vector.extract_strided_slice %6 {offsets = [0, 0], sizes = [8, 96], strides = [1, 1]} : vector<8x128xf32> to vector<8x96xf32>
    %8 = arith.negf %7 : vector<8x96xf32>
    %9 = math.exp %8 : vector<8x96xf32>
    %cst_6 = arith.constant 1.000000e+00 : f32
    %10 = vector.broadcast %cst_6 : f32 to vector<8x96xf32>
    %11 = arith.addf %10, %9 : vector<8x96xf32>
    %12 = arith.divf %10, %11 : vector<8x96xf32>
    %13 = vector.extract_strided_slice %6 {offsets = [0, 96], sizes = [8, 32], strides = [1, 1]} : vector<8x128xf32> to vector<8x32xf32>
    %14 = math.tanh %13 : vector<8x32xf32>
    %15 = vector.extract_strided_slice %12 {offsets = [0, 0], sizes = [8, 32], strides = [1, 1]} : vector<8x96xf32> to vector<8x32xf32>
    %16 = vector.extract_strided_slice %12 {offsets = [0, 32], sizes = [8, 32], strides = [1, 1]} : vector<8x96xf32> to vector<8x32xf32>
    %17 = vector.extract_strided_slice %12 {offsets = [0, 64], sizes = [8, 32], strides = [1, 1]} : vector<8x96xf32> to vector<8x32xf32>
    %18 = arith.mulf %16, %2 : vector<8x32xf32>
    %19 = arith.mulf %15, %14 : vector<8x32xf32>
    %20 = arith.addf %18, %19 : vector<8x32xf32>
    %21 = math.tanh %20 : vector<8x32xf32>
    %22 = arith.mulf %17, %21 : vector<8x32xf32>
    %c0_7 = arith.constant 0 : index
    %c0_8 = arith.constant 0 : index
    %23 = vector.load %arg6[%c0_7, %c0_8] : memref<64x32xf32, #tpu.memory_space<vmem>>, vector<8x32xf32>
    tpu.vector_store %arg6[%c0_7, %c0_8], %22 {strides = array<i32>} : memref<64x32xf32, #tpu.memory_space<vmem>>, vector<8x32xf32>,
    %c1 = arith.constant 1 : index
    %c0_9 = arith.constant 0 : index
    %c0_10 = arith.constant 0 : index
    %24 = vector.load %arg1[%c1, %c0_9, %c0_10] : memref<8x8x128xf32, #tpu.memory_space<vmem>>, vector<1x8x128xf32>
    %25 = vector.shape_cast %24 : vector<1x8x128xf32> to vector<8x128xf32>
    %cst_11 = arith.constant dense<0.000000e+00> : vector<8x128xf32>
    %26 = tpu.matmul %22, %0, %cst_11 {dimension_numbers = #tpu.dot_dimension_numbers<[1], [0], [0], [1], [0, 0, 1, 1], [], []>} : vector<8x32xf32>, vector<32x128xf32>, vector<8x128xf32> -> vector<8x128xf32>
    %27 = arith.addf %25, %26 : vector<8x128xf32>
    %28 = vector.extract_strided_slice %27 {offsets = [0, 0], sizes = [8, 96], strides = [1, 1]} : vector<8x128xf32> to vector<8x96xf32>
    %29 = arith.negf %28 : vector<8x96xf32>
    %30 = math.exp %29 : vector<8x96xf32>
    %cst_12 = arith.constant 1.000000e+00 : f32
    %31 = vector.broadcast %cst_12 : f32 to vector<8x96xf32>
    %32 = arith.addf %31, %30 : vector<8x96xf32>
    %33 = arith.divf %31, %32 : vector<8x96xf32>
    %34 = vector.extract_strided_slice %27 {offsets = [0, 96], sizes = [8, 32], strides = [1, 1]} : vector<8x128xf32> to vector<8x32xf32>
    %35 = math.tanh %34 : vector<8x32xf32>
    %36 = vector.extract_strided_slice %33 {offsets = [0, 0], sizes = [8, 32], strides = [1, 1]} : vector<8x96xf32> to vector<8x32xf32>
    %37 = vector.extract_strided_slice %33 {offsets = [0, 32], sizes = [8, 32], strides = [1, 1]} : vector<8x96xf32> to vector<8x32xf32>
    %38 = vector.extract_strided_slice %33 {offsets = [0, 64], sizes = [8, 32], strides = [1, 1]} : vector<8x96xf32> to vector<8x32xf32>
    %39 = arith.mulf %37, %20 : vector<8x32xf32>
    %40 = arith.mulf %36, %35 : vector<8x32xf32>
    %41 = arith.addf %39, %40 : vector<8x32xf32>
    %42 = math.tanh %41 : vector<8x32xf32>
    %43 = arith.mulf %38, %42 : vector<8x32xf32>
    %c8 = arith.constant 8 : index
    %c0_13 = arith.constant 0 : index
    %44 = vector.load %arg6[%c8, %c0_13] : memref<64x32xf32, #tpu.memory_space<vmem>>, vector<8x32xf32>
    tpu.vector_store %arg6[%c8, %c0_13], %43 {strides = array<i32>} : memref<64x32xf32, #tpu.memory_space<vmem>>, vector<8x32xf32>,
    %c2 = arith.constant 2 : index
    %c0_14 = arith.constant 0 : index
    %c0_15 = arith.constant 0 : index
    %45 = vector.load %arg1[%c2, %c0_14, %c0_15] : memref<8x8x128xf32, #tpu.memory_space<vmem>>, vector<1x8x128xf32>
    %46 = vector.shape_cast %45 : vector<1x8x128xf32> to vector<8x128xf32>
    %cst_16 = arith.constant dense<0.000000e+00> : vector<8x128xf32>
    %47 = tpu.matmul %43, %0, %cst_16 {dimension_numbers = #tpu.dot_dimension_numbers<[1], [0], [0], [1], [0, 0, 1, 1], [], []>} : vector<8x32xf32>, vector<32x128xf32>, vector<8x128xf32> -> vector<8x128xf32>
    %48 = arith.addf %46, %47 : vector<8x128xf32>
    %49 = vector.extract_strided_slice %48 {offsets = [0, 0], sizes = [8, 96], strides = [1, 1]} : vector<8x128xf32> to vector<8x96xf32>
    %50 = arith.negf %49 : vector<8x96xf32>
    %51 = math.exp %50 : vector<8x96xf32>
    %cst_17 = arith.constant 1.000000e+00 : f32
    %52 = vector.broadcast %cst_17 : f32 to vector<8x96xf32>
    %53 = arith.addf %52, %51 : vector<8x96xf32>
    %54 = arith.divf %52, %53 : vector<8x96xf32>
    %55 = vector.extract_strided_slice %48 {offsets = [0, 96], sizes = [8, 32], strides = [1, 1]} : vector<8x128xf32> to vector<8x32xf32>
    %56 = math.tanh %55 : vector<8x32xf32>
    %57 = vector.extract_strided_slice %54 {offsets = [0, 0], sizes = [8, 32], strides = [1, 1]} : vector<8x96xf32> to vector<8x32xf32>
    %58 = vector.extract_strided_slice %54 {offsets = [0, 32], sizes = [8, 32], strides = [1, 1]} : vector<8x96xf32> to vector<8x32xf32>
    %59 = vector.extract_strided_slice %54 {offsets = [0, 64], sizes = [8, 32], strides = [1, 1]} : vector<8x96xf32> to vector<8x32xf32>
    %60 = arith.mulf %58, %41 : vector<8x32xf32>
    %61 = arith.mulf %57, %56 : vector<8x32xf32>
    %62 = arith.addf %60, %61 : vector<8x32xf32>
    %63 = math.tanh %62 : vector<8x32xf32>
    %64 = arith.mulf %59, %63 : vector<8x32xf32>
    %c16 = arith.constant 16 : index
    %c0_18 = arith.constant 0 : index
    %65 = vector.load %arg6[%c16, %c0_18] : memref<64x32xf32, #tpu.memory_space<vmem>>, vector<8x32xf32>
    tpu.vector_store %arg6[%c16, %c0_18], %64 {strides = array<i32>} : memref<64x32xf32, #tpu.memory_space<vmem>>, vector<8x32xf32>,
    %c3 = arith.constant 3 : index
    %c0_19 = arith.constant 0 : index
    %c0_20 = arith.constant 0 : index
    %66 = vector.load %arg1[%c3, %c0_19, %c0_20] : memref<8x8x128xf32, #tpu.memory_space<vmem>>, vector<1x8x128xf32>
    %67 = vector.shape_cast %66 : vector<1x8x128xf32> to vector<8x128xf32>
    %cst_21 = arith.constant dense<0.000000e+00> : vector<8x128xf32>
    %68 = tpu.matmul %64, %0, %cst_21 {dimension_numbers = #tpu.dot_dimension_numbers<[1], [0], [0], [1], [0, 0, 1, 1], [], []>} : vector<8x32xf32>, vector<32x128xf32>, vector<8x128xf32> -> vector<8x128xf32>
    %69 = arith.addf %67, %68 : vector<8x128xf32>
    %70 = vector.extract_strided_slice %69 {offsets = [0, 0], sizes = [8, 96], strides = [1, 1]} : vector<8x128xf32> to vector<8x96xf32>
    %71 = arith.negf %70 : vector<8x96xf32>
    %72 = math.exp %71 : vector<8x96xf32>
    %cst_22 = arith.constant 1.000000e+00 : f32
    %73 = vector.broadcast %cst_22 : f32 to vector<8x96xf32>
    %74 = arith.addf %73, %72 : vector<8x96xf32>
    %75 = arith.divf %73, %74 : vector<8x96xf32>
    %76 = vector.extract_strided_slice %69 {offsets = [0, 96], sizes = [8, 32], strides = [1, 1]} : vector<8x128xf32> to vector<8x32xf32>
    %77 = math.tanh %76 : vector<8x32xf32>
    %78 = vector.extract_strided_slice %75 {offsets = [0, 0], sizes = [8, 32], strides = [1, 1]} : vector<8x96xf32> to vector<8x32xf32>
    %79 = vector.extract_strided_slice %75 {offsets = [0, 32], sizes = [8, 32], strides = [1, 1]} : vector<8x96xf32> to vector<8x32xf32>
    %80 = vector.extract_strided_slice %75 {offsets = [0, 64], sizes = [8, 32], strides = [1, 1]} : vector<8x96xf32> to vector<8x32xf32>
    %81 = arith.mulf %79, %62 : vector<8x32xf32>
    %82 = arith.mulf %78, %77 : vector<8x32xf32>
    %83 = arith.addf %81, %82 : vector<8x32xf32>
    %84 = math.tanh %83 : vector<8x32xf32>
    %85 = arith.mulf %80, %84 : vector<8x32xf32>
    %c24 = arith.constant 24 : index
    %c0_23 = arith.constant 0 : index
    %86 = vector.load %arg6[%c24, %c0_23] : memref<64x32xf32, #tpu.memory_space<vmem>>, vector<8x32xf32>
    tpu.vector_store %arg6[%c24, %c0_23], %85 {strides = array<i32>} : memref<64x32xf32, #tpu.memory_space<vmem>>, vector<8x32xf32>,
    %c4 = arith.constant 4 : index
    %c0_24 = arith.constant 0 : index
    %c0_25 = arith.constant 0 : index
    %87 = vector.load %arg1[%c4, %c0_24, %c0_25] : memref<8x8x128xf32, #tpu.memory_space<vmem>>, vector<1x8x128xf32>
    %88 = vector.shape_cast %87 : vector<1x8x128xf32> to vector<8x128xf32>
    %cst_26 = arith.constant dense<0.000000e+00> : vector<8x128xf32>
    %89 = tpu.matmul %85, %0, %cst_26 {dimension_numbers = #tpu.dot_dimension_numbers<[1], [0], [0], [1], [0, 0, 1, 1], [], []>} : vector<8x32xf32>, vector<32x128xf32>, vector<8x128xf32> -> vector<8x128xf32>
    %90 = arith.addf %88, %89 : vector<8x128xf32>
    %91 = vector.extract_strided_slice %90 {offsets = [0, 0], sizes = [8, 96], strides = [1, 1]} : vector<8x128xf32> to vector<8x96xf32>
    %92 = arith.negf %91 : vector<8x96xf32>
    %93 = math.exp %92 : vector<8x96xf32>
    %cst_27 = arith.constant 1.000000e+00 : f32
    %94 = vector.broadcast %cst_27 : f32 to vector<8x96xf32>
    %95 = arith.addf %94, %93 : vector<8x96xf32>
    %96 = arith.divf %94, %95 : vector<8x96xf32>
    %97 = vector.extract_strided_slice %90 {offsets = [0, 96], sizes = [8, 32], strides = [1, 1]} : vector<8x128xf32> to vector<8x32xf32>
    %98 = math.tanh %97 : vector<8x32xf32>
    %99 = vector.extract_strided_slice %96 {offsets = [0, 0], sizes = [8, 32], strides = [1, 1]} : vector<8x96xf32> to vector<8x32xf32>
    %100 = vector.extract_strided_slice %96 {offsets = [0, 32], sizes = [8, 32], strides = [1, 1]} : vector<8x96xf32> to vector<8x32xf32>
    %101 = vector.extract_strided_slice %96 {offsets = [0, 64], sizes = [8, 32], strides = [1, 1]} : vector<8x96xf32> to vector<8x32xf32>
    %102 = arith.mulf %100, %83 : vector<8x32xf32>
    %103 = arith.mulf %99, %98 : vector<8x32xf32>
    %104 = arith.addf %102, %103 : vector<8x32xf32>
    %105 = math.tanh %104 : vector<8x32xf32>
    %106 = arith.mulf %101, %105 : vector<8x32xf32>
    %c32 = arith.constant 32 : index
    %c0_28 = arith.constant 0 : index
    %107 = vector.load %arg6[%c32, %c0_28] : memref<64x32xf32, #tpu.memory_space<vmem>>, vector<8x32xf32>
    tpu.vector_store %arg6[%c32, %c0_28], %106 {strides = array<i32>} : memref<64x32xf32, #tpu.memory_space<vmem>>, vector<8x32xf32>,
    %c5 = arith.constant 5 : index
    %c0_29 = arith.constant 0 : index
    %c0_30 = arith.constant 0 : index
    %108 = vector.load %arg1[%c5, %c0_29, %c0_30] : memref<8x8x128xf32, #tpu.memory_space<vmem>>, vector<1x8x128xf32>
    %109 = vector.shape_cast %108 : vector<1x8x128xf32> to vector<8x128xf32>
    %cst_31 = arith.constant dense<0.000000e+00> : vector<8x128xf32>
    %110 = tpu.matmul %106, %0, %cst_31 {dimension_numbers = #tpu.dot_dimension_numbers<[1], [0], [0], [1], [0, 0, 1, 1], [], []>} : vector<8x32xf32>, vector<32x128xf32>, vector<8x128xf32> -> vector<8x128xf32>
    %111 = arith.addf %109, %110 : vector<8x128xf32>
    %112 = vector.extract_strided_slice %111 {offsets = [0, 0], sizes = [8, 96], strides = [1, 1]} : vector<8x128xf32> to vector<8x96xf32>
    %113 = arith.negf %112 : vector<8x96xf32>
    %114 = math.exp %113 : vector<8x96xf32>
    %cst_32 = arith.constant 1.000000e+00 : f32
    %115 = vector.broadcast %cst_32 : f32 to vector<8x96xf32>
    %116 = arith.addf %115, %114 : vector<8x96xf32>
    %117 = arith.divf %115, %116 : vector<8x96xf32>
    %118 = vector.extract_strided_slice %111 {offsets = [0, 96], sizes = [8, 32], strides = [1, 1]} : vector<8x128xf32> to vector<8x32xf32>
    %119 = math.tanh %118 : vector<8x32xf32>
    %120 = vector.extract_strided_slice %117 {offsets = [0, 0], sizes = [8, 32], strides = [1, 1]} : vector<8x96xf32> to vector<8x32xf32>
    %121 = vector.extract_strided_slice %117 {offsets = [0, 32], sizes = [8, 32], strides = [1, 1]} : vector<8x96xf32> to vector<8x32xf32>
    %122 = vector.extract_strided_slice %117 {offsets = [0, 64], sizes = [8, 32], strides = [1, 1]} : vector<8x96xf32> to vector<8x32xf32>
    %123 = arith.mulf %121, %104 : vector<8x32xf32>
    %124 = arith.mulf %120, %119 : vector<8x32xf32>
    %125 = arith.addf %123, %124 : vector<8x32xf32>
    %126 = math.tanh %125 : vector<8x32xf32>
    %127 = arith.mulf %122, %126 : vector<8x32xf32>
    %c40 = arith.constant 40 : index
    %c0_33 = arith.constant 0 : index
    %128 = vector.load %arg6[%c40, %c0_33] : memref<64x32xf32, #tpu.memory_space<vmem>>, vector<8x32xf32>
    tpu.vector_store %arg6[%c40, %c0_33], %127 {strides = array<i32>} : memref<64x32xf32, #tpu.memory_space<vmem>>, vector<8x32xf32>,
    %c6 = arith.constant 6 : index
    %c0_34 = arith.constant 0 : index
    %c0_35 = arith.constant 0 : index
    %129 = vector.load %arg1[%c6, %c0_34, %c0_35] : memref<8x8x128xf32, #tpu.memory_space<vmem>>, vector<1x8x128xf32>
    %130 = vector.shape_cast %129 : vector<1x8x128xf32> to vector<8x128xf32>
    %cst_36 = arith.constant dense<0.000000e+00> : vector<8x128xf32>
    %131 = tpu.matmul %127, %0, %cst_36 {dimension_numbers = #tpu.dot_dimension_numbers<[1], [0], [0], [1], [0, 0, 1, 1], [], []>} : vector<8x32xf32>, vector<32x128xf32>, vector<8x128xf32> -> vector<8x128xf32>
    %132 = arith.addf %130, %131 : vector<8x128xf32>
    %133 = vector.extract_strided_slice %132 {offsets = [0, 0], sizes = [8, 96], strides = [1, 1]} : vector<8x128xf32> to vector<8x96xf32>
    %134 = arith.negf %133 : vector<8x96xf32>
    %135 = math.exp %134 : vector<8x96xf32>
    %cst_37 = arith.constant 1.000000e+00 : f32
    %136 = vector.broadcast %cst_37 : f32 to vector<8x96xf32>
    %137 = arith.addf %136, %135 : vector<8x96xf32>
    %138 = arith.divf %136, %137 : vector<8x96xf32>
    %139 = vector.extract_strided_slice %132 {offsets = [0, 96], sizes = [8, 32], strides = [1, 1]} : vector<8x128xf32> to vector<8x32xf32>
    %140 = math.tanh %139 : vector<8x32xf32>
    %141 = vector.extract_strided_slice %138 {offsets = [0, 0], sizes = [8, 32], strides = [1, 1]} : vector<8x96xf32> to vector<8x32xf32>
    %142 = vector.extract_strided_slice %138 {offsets = [0, 32], sizes = [8, 32], strides = [1, 1]} : vector<8x96xf32> to vector<8x32xf32>
    %143 = vector.extract_strided_slice %138 {offsets = [0, 64], sizes = [8, 32], strides = [1, 1]} : vector<8x96xf32> to vector<8x32xf32>
    %144 = arith.mulf %142, %125 : vector<8x32xf32>
    %145 = arith.mulf %141, %140 : vector<8x32xf32>
    %146 = arith.addf %144, %145 : vector<8x32xf32>
    %147 = math.tanh %146 : vector<8x32xf32>
    %148 = arith.mulf %143, %147 : vector<8x32xf32>
    %c48 = arith.constant 48 : index
    %c0_38 = arith.constant 0 : index
    %149 = vector.load %arg6[%c48, %c0_38] : memref<64x32xf32, #tpu.memory_space<vmem>>, vector<8x32xf32>
    tpu.vector_store %arg6[%c48, %c0_38], %148 {strides = array<i32>} : memref<64x32xf32, #tpu.memory_space<vmem>>, vector<8x32xf32>,
    %c7 = arith.constant 7 : index
    %c0_39 = arith.constant 0 : index
    %c0_40 = arith.constant 0 : index
    %150 = vector.load %arg1[%c7, %c0_39, %c0_40] : memref<8x8x128xf32, #tpu.memory_space<vmem>>, vector<1x8x128xf32>
    %151 = vector.shape_cast %150 : vector<1x8x128xf32> to vector<8x128xf32>
    %cst_41 = arith.constant dense<0.000000e+00> : vector<8x128xf32>
    %152 = tpu.matmul %148, %0, %cst_41 {dimension_numbers = #tpu.dot_dimension_numbers<[1], [0], [0], [1], [0, 0, 1, 1], [], []>} : vector<8x32xf32>, vector<32x128xf32>, vector<8x128xf32> -> vector<8x128xf32>
    %153 = arith.addf %151, %152 : vector<8x128xf32>
    %154 = vector.extract_strided_slice %153 {offsets = [0, 0], sizes = [8, 96], strides = [1, 1]} : vector<8x128xf32> to vector<8x96xf32>
    %155 = arith.negf %154 : vector<8x96xf32>
    %156 = math.exp %155 : vector<8x96xf32>
    %cst_42 = arith.constant 1.000000e+00 : f32
    %157 = vector.broadcast %cst_42 : f32 to vector<8x96xf32>
    %158 = arith.addf %157, %156 : vector<8x96xf32>
    %159 = arith.divf %157, %158 : vector<8x96xf32>
    %160 = vector.extract_strided_slice %153 {offsets = [0, 96], sizes = [8, 32], strides = [1, 1]} : vector<8x128xf32> to vector<8x32xf32>
    %161 = math.tanh %160 : vector<8x32xf32>
    %162 = vector.extract_strided_slice %159 {offsets = [0, 0], sizes = [8, 32], strides = [1, 1]} : vector<8x96xf32> to vector<8x32xf32>
    %163 = vector.extract_strided_slice %159 {offsets = [0, 32], sizes = [8, 32], strides = [1, 1]} : vector<8x96xf32> to vector<8x32xf32>
    %164 = vector.extract_strided_slice %159 {offsets = [0, 64], sizes = [8, 32], strides = [1, 1]} : vector<8x96xf32> to vector<8x32xf32>
    %165 = arith.mulf %163, %146 : vector<8x32xf32>
    %166 = arith.mulf %162, %161 : vector<8x32xf32>
    %167 = arith.addf %165, %166 : vector<8x32xf32>
    %168 = math.tanh %167 : vector<8x32xf32>
    %169 = arith.mulf %164, %168 : vector<8x32xf32>
    %c56 = arith.constant 56 : index
    %c0_43 = arith.constant 0 : index
    %170 = vector.load %arg6[%c56, %c0_43] : memref<64x32xf32, #tpu.memory_space<vmem>>, vector<8x32xf32>
    tpu.vector_store %arg6[%c56, %c0_43], %169 {strides = array<i32>} : memref<64x32xf32, #tpu.memory_space<vmem>>, vector<8x32xf32>,
    %c0_44 = arith.constant 0 : index
    %c0_45 = arith.constant 0 : index
    %171 = vector.load %arg6[%c0_44, %c0_45] : memref<64x32xf32, #tpu.memory_space<vmem>>, vector<64x32xf32>
    %c0_46 = arith.constant 0 : index
    %c0_47 = arith.constant 0 : index
    %172 = vector.load %arg3[%c0_46, %c0_47] : memref<32x1xf32, #tpu.memory_space<vmem>>, vector<32x1xf32>
    %cst_48 = arith.constant dense<0.000000e+00> : vector<64x1xf32>
    %173 = tpu.matmul %171, %172, %cst_48 {dimension_numbers = #tpu.dot_dimension_numbers<[1], [0], [0], [1], [0, 0, 1, 1], [], []>} : vector<64x32xf32>, vector<32x1xf32>, vector<64x1xf32> -> vector<64x1xf32>
    %c0_49 = arith.constant 0 : index
    %c0_50 = arith.constant 0 : index
    %174 = vector.load %arg4[%c0_49, %c0_50] : memref<1x1xf32, #tpu.memory_space<vmem>>, vector<1x1xf32>
    %175 = vector.broadcast %174 : vector<1x1xf32> to vector<64x1xf32>
    %176 = arith.addf %173, %175 : vector<64x1xf32>
    %c0_51 = arith.constant 0 : index
    %c0_52 = arith.constant 0 : index
    %177 = vector.load %arg5[%c0_51, %c0_52] : memref<64x1xf32, #tpu.memory_space<vmem>>, vector<64x1xf32>
    tpu.vector_store %arg5[%c0_51, %c0_52], %176 {strides = array<i32>} : memref<64x1xf32, #tpu.memory_space<vmem>>, vector<64x1xf32>,
    return
  }
  func.func @transform_0(%arg0: i32) -> (i32, i32, i32) {
    %c0_i32 = arith.constant 0 : i32
    %c0_i32_0 = arith.constant 0 : i32
    %c0_i32_1 = arith.constant 0 : i32
    %c0_i32_2 = arith.constant 0 : i32
    return %c0_i32, %c0_i32_0, %c0_i32_1 : i32, i32, i32
  }
  func.func @transform_1(%arg0: i32) -> (i32, i32) {
    %c0_i32 = arith.constant 0 : i32
    %c0_i32_0 = arith.constant 0 : i32
    %c0_i32_1 = arith.constant 0 : i32
    return %c0_i32, %c0_i32_0 : i32, i32
  }
  func.func @transform_2(%arg0: i32) -> (i32, i32) {
    %c0_i32 = arith.constant 0 : i32
    %c0_i32_0 = arith.constant 0 : i32
    %c0_i32_1 = arith.constant 0 : i32
    return %c0_i32, %c0_i32_0 : i32, i32
  }
  func.func @transform_3(%arg0: i32) -> (i32, i32) {
    %c0_i32 = arith.constant 0 : i32
    %c0_i32_0 = arith.constant 0 : i32
    %c0_i32_1 = arith.constant 0 : i32
    return %c0_i32, %c0_i32_0 : i32, i32
  }
  func.func @transform_4(%arg0: i32) -> (i32, i32) {
    %c0_i32 = arith.constant 0 : i32
    %c0_i32_0 = arith.constant 0 : i32
    %c0_i32_1 = arith.constant 0 : i32
    return %c0_i32, %c0_i32_0 : i32, i32
  }
}

</mosaic_0001>

<bundles_post_ra>
// kernel: tpu_custom_call.1
= control target key start
LH: loop header
LB: loop body
LE: loop exit
PB: predicated region body
PF: predicated region fallthrough
CT: control target
= control target key end

     0   :  { %s1594_s0 = inlined_call_operand.hbm [shape: f32[8,8,128], index: 0, kind: input, shape index: {}]   ;;  %s1595_s1 = inlined_call_operand.vmem [shape: f32[32,128], index: 1, kind: input, shape index: {}]   ;;  %s1596_s2 = inlined_call_operand.vmem [shape: f32[32,1], index: 2, kind: input, shape index: {}]   ;;  %s1597_s3 = inlined_call_operand.<no memory space> [shape: f32[1,1], index: 3, kind: input, shape index: {}]   ;;  %s1598_s4 = inlined_call_operand.vmem [shape: f32[64,1], index: 4, kind: output, shape index: {}]  }
   0x1   :  { %v9_v0 = vstv %s1597_s3 }
   0x2   :  { %10 = vst [vmem:[#allocation3] sm:$0x1] %v9_v0 }
   0x3   :  { %11 = vsyncpa [#allocation5], 0  ;;  %s1368_s17 = smov [#allocation4]   ;;  %s1344_s21 = scalar_lea.hbm %s1594_s0, 1024 }
   0x4   :  { %s17_s18 = sshll.u32 %s1368_s17, 4  ;;  %p1345_p0 = scmp.ne.s32.totalorder %s1594_s0, %s1344_s21  ;;  %s18_s18 = int_to_ptr.vmem [resolvable:$true] %s17_s18 }
   0x5   :  { %p1348_p1 = scmp.lt.u32.totalorder %s1344_s21, %s1594_s0 }
   0x7   :  { %p1350_p2 = pnand %p1348_p1, %p1345_p0 }
   0x9   :  { %1353 = shalt.err (!%p1350_p2)
}
   0xa   :  { %s1354_s3 = scalar_lea.vmem %s18_s18, 1024  ;;  %p1359_p4 = scmp.lt.s32.totalorder %s18_s18, %s18_s18 }
   0xb   :  { %p1355_p3 = scmp.ne.s32.totalorder %s18_s18, %s1354_s3  ;;  %p1360_p5 = scmp.lt.s32.totalorder %s1354_s3, %s1354_s3 }
   0xd   :  { %p1361_p6 = por %p1360_p5, %p1359_p4 }
   0xf   :  { %p1362_p7 = pnand %p1361_p6, %p1355_p3 }
  0x11   :  { %1365 = shalt.err (!%p1362_p7)
}
  0x12   :  { %s1369_s26 = smov 128   ;;  %s1370_s27 = smov 8  }
  0x13   :  { %23 = dma.hbm_to_vmem [thread:$0]  %s1594_s0, 1024, %s18_s18, [#allocation5], %s1369_s26, %s1369_s26, %s1370_s27  }
  0x14   :  { %1366 = dma.done.wait [#allocation5], 1024  }
  0x15   :  { %1367 = vsyncadd [#allocation5], 4294966272  ;;  %v1371_v1 = vmov 0.0|0.0   ;;  %vm1372_vm0 = vmmov 0   ;;  %v1373_v2 = vmov 0.0   ;;  %v33_v3 = vld [vmem:[%s1595_s1] sm:$0xff] }
  0x16   :  { %1216 = vmatprep.subr.bf16.mxu1 %v1371_v1  ;;  %1116 = vmatprep.mubr.msk.f32.mxu1 %vm1372_vm0, %v1373_v2  ;;  %v34_v4 = vld [vmem:[%s1595_s1 + $0x8] sm:$0xff]  ;;  %v35_v5 = vld [vmem:[%s1595_s1 + $0x10] sm:$0xff]  ;;  %v36_v7 = vld [vmem:[%s1595_s1 + $0x18] sm:$0xff]  ;;  %s1374_s1 = smov 32   ;;  %s1375_s11 = smov 64   ;;  %vm38_vm1 = vcmask 261120  }
  0x17   :  { %1228 = vmatprep.subr.bf16.mxu0 %v1371_v1  ;;  %1138 = vmatprep.mubr.msk.f32.mxu0 %vm1372_vm0, %v1373_v2  ;;  %v1431_v6 = vpack.c.bf16 %v34_v4, %v33_v3  ;;  %v1437_v8 = vpack.c.bf16 %v36_v7, %v35_v5  ;;  %v37_v9 = vld [vmem:[#allocation4] sm:$0xff]  ;;  %v143_v27 = vld [vmem:[#allocation4 + $0x8] sm:$0xff]  ;;  %v247_v45 = vld [vmem:[#allocation4 + $0x10] sm:$0xff]  ;;  %vm1018_vm2 = vcmask 7168  }
  0x18   :  { %v351_v63 = vld [vmem:[#allocation4 + $0x18] sm:$0xff] }
  0x19   :  { %1218 = vmatpush3.bf16.msra.mxu1 %v1431_v6  ;;  %1230 = vmatpush3.bf16.msra.mxu0 %v1431_v6 }
  0x1a   :  { %1219 = vmatprep.subr.bf16.mxu1 %v1371_v1  ;;  %1231 = vmatprep.subr.bf16.mxu0 %v1371_v1 }
  0x1d   :  { %1221 = vmatpush3.bf16.msra.mxu1 %v1437_v8  ;;  %1233 = vmatpush3.bf16.msra.mxu0 %v1437_v8 }
  0x1e   :  { %1222 = vmatprep.subr.bf16.mxu1 %v1371_v1  ;;  %1240 = vmatprep.subr.bf16.mxu0 %v1371_v1 }
  0x20   :  { %1117 = vmatmul.mubr.f32.vlgmr.msra.gmra.mrb[0].mxu1 %v1373_v2 }
  0x21   :  { %1224 = vmatpush3.bf16.msra.mxu1 %v1431_v6  ;;  %1127 = vmatprep.mubr.msk.f32.mxu1 %vm1372_vm0, %v1373_v2 }
  0x22   :  { %1225 = vmatprep.subr.bf16.mxu1 %v1371_v1 }
  0x25   :  { %1227 = vmatpush3.bf16.msra.mxu1 %v1437_v8 }
  0x26   :  { %1234 = vmatprep.subr.bf16.mxu1 %v1371_v1 }
  0xf3   :  { %v108_v10 = vpop.f32.mrb[0].mxu1 }
  0xf4   :  { %v112_v11 = vadd.f32 %v108_v10, %v37_v9  ;;  %v1118_v12 = vpop.f32.mrb[1].mxu1 }
  0xf6   :  { %1280 = vtanh.f32 %v112_v11  ;;  %v1032_v14 = vmul.f32 -1.442695, %v112_v11 }
  0xf8   :  { %1282 = vpow2.f32 %v1032_v14 }
 0x100   :  { %v1281_v13 = vpop.eup %1280 }
 0x101   :  { %122 = vrot.lane.b32.xlu0 %v1281_v13, %s1374_s1 }
 0x102   :  { %v1283_v15 = vpop.eup %1282 }
 0x103   :  { %v116_v16 = vadd.f32 1.0, %v1283_v15 }
 0x105   :  { %1284 = vrcp.f32 %v116_v16 }
 0x10f   :  { %v1285_v17 = vpop.eup %1284 }
 0x110   :  { %v120_v20 = vmul.f32 0.0, %v1285_v17 }
 0x173   :  { %v123_v18 = vpop.permute.xlu0 %122 }
 0x174   :  { %v125_v19 = vmul.f32 %v1285_v17, %v123_v18 }
 0x176   :  { %127 = vrot.lane.b32.xlu0 %v125_v19, %s1374_s1 }
 0x1e8   :  { %v128_v21 = vpop.permute.xlu0 %127 }
 0x1e9   :  { %v130_v22 = vadd.f32 %v128_v21, %v120_v20  ;;  %v455_v21 = vld [vmem:[#allocation4 + $0x20] sm:$0xff] }
 0x1eb   :  { %1286 = vtanh.f32 %v130_v22 }
 0x1f5   :  { %v1287_v23 = vpop.eup %1286 }
 0x1f6   :  { %133 = vrot.lane.b32.xlu1 %v1287_v23, %s1374_s1 }
 0x268   :  { %v134_v24 = vpop.permute.xlu1 %133 }
 0x269   :  { %v136_v25 = vmul.f32 %v1285_v17, %v134_v24 }
 0x26b   :  { %138 = vrot.lane.b32.xlu1 %v136_v25, %s1375_s11 }
 0x2dd   :  { %v139_v26 = vpop.permute.xlu1 %138 }
 0x2de   :  { %141 = vst.msk [vmem:[#allocation2] sm:$0xff] %vm38_vm1, %v139_v26  ;;  %1128 = vmatmul.mubr.msk.f32.vlgmr.msra.gmra.mrb[2].mxu1 %vm38_vm1, %v139_v26 }
 0x2df   :  { %1236 = vmatpush3.bf16.msra.mxu1 %v1431_v6  ;;  %1149 = vmatprep.mubr.msk.f32.mxu1 %vm1372_vm0, %v1373_v2 }
 0x2e0   :  { %1237 = vmatprep.subr.bf16.mxu1 %v1371_v1 }
 0x2e3   :  { %1239 = vmatpush3.bf16.msra.mxu1 %v1437_v8 }
 0x2e4   :  { %1246 = vmatprep.subr.bf16.mxu1 %v1371_v1 }
 0x3b1   :  { %v212_v28 = vpop.f32.mrb[2].mxu1 }
 0x3b2   :  { %v216_v29 = vadd.f32 %v212_v28, %v143_v27  ;;  %v1129_v30 = vpop.f32.mrb[3].mxu1 }
 0x3b4   :  { %1288 = vtanh.f32 %v216_v29  ;;  %v1034_v32 = vmul.f32 -1.442695, %v216_v29 }
 0x3b6   :  { %1290 = vpow2.f32 %v1034_v32 }
 0x3be   :  { %v1289_v31 = vpop.eup %1288 }
 0x3bf   :  { %226 = vrot.lane.b32.xlu0 %v1289_v31, %s1374_s1 }
 0x3c0   :  { %v1291_v33 = vpop.eup %1290 }
 0x3c1   :  { %v220_v34 = vadd.f32 1.0, %v1291_v33 }
 0x3c3   :  { %1292 = vrcp.f32 %v220_v34 }
 0x3cd   :  { %v1293_v35 = vpop.eup %1292 }
 0x3ce   :  { %v224_v38 = vmul.f32 %v1293_v35, %v130_v22 }
 0x431   :  { %v227_v36 = vpop.permute.xlu0 %226 }
 0x432   :  { %v229_v37 = vmul.f32 %v1293_v35, %v227_v36 }
 0x434   :  { %231 = vrot.lane.b32.xlu1 %v229_v37, %s1374_s1 }
 0x4a6   :  { %v232_v39 = vpop.permute.xlu1 %231 }
 0x4a7   :  { %v234_v40 = vadd.f32 %v232_v39, %v224_v38  ;;  %v559_v39 = vld [vmem:[#allocation4 + $0x28] sm:$0xff] }
 0x4a9   :  { %1294 = vtanh.f32 %v234_v40 }
 0x4b3   :  { %v1295_v41 = vpop.eup %1294 }
 0x4b4   :  { %237 = vrot.lane.b32.xlu0 %v1295_v41, %s1374_s1 }
 0x526   :  { %v238_v42 = vpop.permute.xlu0 %237 }
 0x527   :  { %v240_v43 = vmul.f32 %v1293_v35, %v238_v42 }
 0x529   :  { %242 = vrot.lane.b32.xlu1 %v240_v43, %s1375_s11 }
 0x59b   :  { %v243_v44 = vpop.permute.xlu1 %242 }
 0x59c   :  { %245 = vst.msk [vmem:[#allocation2 + $0x8] sm:$0xff] %vm38_vm1, %v243_v44  ;;  %1139 = vmatmul.mubr.msk.f32.vlgmr.msra.gmra.mrb[0].mxu0 %vm38_vm1, %v243_v44 }
 0x59d   :  { %1242 = vmatpush3.bf16.msra.mxu0 %v1431_v6  ;;  %1160 = vmatprep.mubr.msk.f32.mxu0 %vm1372_vm0, %v1373_v2 }
 0x59e   :  { %1243 = vmatprep.subr.bf16.mxu0 %v1371_v1 }
 0x5a1   :  { %1245 = vmatpush3.bf16.msra.mxu0 %v1437_v8 }
 0x5a2   :  { %1252 = vmatprep.subr.bf16.mxu0 %v1371_v1 }
 0x66f   :  { %v316_v46 = vpop.f32.mrb[0].mxu0 }
 0x670   :  { %v320_v47 = vadd.f32 %v316_v46, %v247_v45  ;;  %v1140_v48 = vpop.f32.mrb[1].mxu0 }
 0x672   :  { %1296 = vtanh.f32 %v320_v47  ;;  %v1036_v50 = vmul.f32 -1.442695, %v320_v47 }
 0x674   :  { %1298 = vpow2.f32 %v1036_v50  ;;  %v879_v50 = vld [vmem:[%s1596_s2 + $0x8] sm:$0xff] }
 0x67c   :  { %v1297_v49 = vpop.eup %1296 }
 0x67d   :  { %330 = vrot.lane.b32.xlu0 %v1297_v49, %s1374_s1  ;;  %v878_v49 = vld [vmem:[%s1596_s2] sm:$0xff] }
 0x67e   :  { %v1299_v51 = vpop.eup %1298 }
 0x67f   :  { %v324_v52 = vadd.f32 1.0, %v1299_v51  ;;  %v1264_v51 = vpack.c.bf16 %v879_v50, %v878_v49 }
 0x681   :  { %1300 = vrcp.f32 %v324_v52 }
 0x68b   :  { %v1301_v53 = vpop.eup %1300 }
 0x68c   :  { %v328_v56 = vmul.f32 %v1301_v53, %v234_v40 }
 0x6ef   :  { %v331_v54 = vpop.permute.xlu0 %330 }
 0x6f0   :  { %v333_v55 = vmul.f32 %v1301_v53, %v331_v54 }
 0x6f2   :  { %335 = vrot.lane.b32.xlu1 %v333_v55, %s1374_s1  ;;  %v880_v55 = vld [vmem:[%s1596_s2 + $0x10] sm:$0xff] }
 0x764   :  { %v336_v57 = vpop.permute.xlu1 %335 }
 0x765   :  { %v338_v58 = vadd.f32 %v336_v57, %v328_v56  ;;  %v881_v56 = vld [vmem:[%s1596_s2 + $0x18] sm:$0xff] }
 0x766   :  { %v1268_v57 = vpack.c.bf16 %v881_v56, %v880_v55 }
 0x767   :  { %1302 = vtanh.f32 %v338_v58 }
 0x771   :  { %v1303_v59 = vpop.eup %1302 }
 0x772   :  { %341 = vrot.lane.b32.xlu0 %v1303_v59, %s1374_s1  ;;  %v870_v59 = vld [vmem:[#allocation2] sm:$0xff] }
 0x7e4   :  { %v342_v60 = vpop.permute.xlu0 %341 }
 0x7e5   :  { %v344_v61 = vmul.f32 %v1301_v53, %v342_v60  ;;  %v871_v60 = vld [vmem:[#allocation2 + $0x8] sm:$0xff] }
 0x7e7   :  { %346 = vrot.lane.b32.xlu1 %v344_v61, %s1375_s11 }
 0x859   :  { %v347_v62 = vpop.permute.xlu1 %346 }
 0x85a   :  { %349 = vst.msk [vmem:[#allocation2 + $0x10] sm:$0xff] %vm38_vm1, %v347_v62  ;;  %1150 = vmatmul.mubr.msk.f32.vlgmr.msra.gmra.mrb[4].mxu1 %vm38_vm1, %v347_v62 }
 0x85b   :  { %1248 = vmatpush3.bf16.msra.mxu1 %v1431_v6  ;;  %1171 = vmatprep.mubr.msk.f32.mxu1 %vm1372_vm0, %v1373_v2 }
 0x85c   :  { %1249 = vmatprep.subr.bf16.mxu1 %v1371_v1 }
 0x85f   :  { %1251 = vmatpush3.bf16.msra.mxu1 %v1437_v8 }
 0x860   :  { %1258 = vmatprep.subr.bf16.mxu1 %v1371_v1 }
 0x861   :  { %v872_v61 = vld [vmem:[#allocation2 + $0x10] sm:$0xff] }
 0x92d   :  { %v420_v0 = vpop.f32.mrb[4].mxu1 }
 0x92e   :  { %v424_v3 = vadd.f32 %v420_v0, %v351_v63  ;;  %v1151_v4 = vpop.f32.mrb[5].mxu1 }
 0x930   :  { %1304 = vtanh.f32 %v424_v3  ;;  %v1038_v7 = vmul.f32 -1.442695, %v424_v3  ;;  %v663_v3 = vld [vmem:[#allocation4 + $0x30] sm:$0xff] }
 0x932   :  { %1306 = vpow2.f32 %v1038_v7 }
 0x93a   :  { %v1305_v5 = vpop.eup %1304 }
 0x93b   :  { %434 = vrot.lane.b32.xlu0 %v1305_v5, %s1374_s1 }
 0x93c   :  { %v1307_v9 = vpop.eup %1306 }
 0x93d   :  { %v428_v10 = vadd.f32 1.0, %v1307_v9  ;;  %v1538_v9 = vld [vmem:[#allocation3] ss:$0 sm:$0xff] }
 0x93f   :  { %1308 = vrcp.f32 %v428_v10 }
 0x949   :  { %v1309_v11 = vpop.eup %1308 }
 0x94a   :  { %v432_v14 = vmul.f32 %v1309_v11, %v338_v58 }
 0x9ad   :  { %v435_v12 = vpop.permute.xlu0 %434 }
 0x9ae   :  { %v437_v13 = vmul.f32 %v1309_v11, %v435_v12 }
 0x9b0   :  { %439 = vrot.lane.b32.xlu1 %v437_v13, %s1374_s1 }
 0xa22   :  { %v440_v15 = vpop.permute.xlu1 %439 }
 0xa23   :  { %v442_v16 = vadd.f32 %v440_v15, %v432_v14 }
 0xa25   :  { %1310 = vtanh.f32 %v442_v16 }
 0xa2f   :  { %v1311_v17 = vpop.eup %1310 }
 0xa30   :  { %445 = vrot.lane.b32.xlu0 %v1311_v17, %s1374_s1 }
 0xaa2   :  { %v446_v18 = vpop.permute.xlu0 %445 }
 0xaa3   :  { %v448_v19 = vmul.f32 %v1309_v11, %v446_v18 }
 0xaa5   :  { %450 = vrot.lane.b32.xlu1 %v448_v19, %s1375_s11 }
 0xb17   :  { %v451_v20 = vpop.permute.xlu1 %450 }
 0xb18   :  { %453 = vst.msk [vmem:[#allocation2 + $0x18] sm:$0xff] %vm38_vm1, %v451_v20  ;;  %1161 = vmatmul.mubr.msk.f32.vlgmr.msra.gmra.mrb[2].mxu0 %vm38_vm1, %v451_v20 }
 0xb19   :  { %1254 = vmatpush3.bf16.msra.mxu0 %v1431_v6  ;;  %1182 = vmatprep.mubr.msk.f32.mxu0 %vm1372_vm0, %v1373_v2 }
 0xb1a   :  { %1255 = vmatprep.subr.bf16.mxu0 %v1371_v1 }
 0xb1d   :  { %1257 = vmatpush3.bf16.msra.mxu0 %v1437_v8 }
 0xb1e   :  { %1265 = vmatprep.subr.bf16.mxu0 %v1264_v51 }
 0xb1f   :  { %v873_v62 = vld [vmem:[#allocation2 + $0x18] sm:$0xff] }
 0xbeb   :  { %v524_v22 = vpop.f32.mrb[2].mxu0 }
 0xbec   :  { %v528_v23 = vadd.f32 %v524_v22, %v455_v21  ;;  %v1162_v24 = vpop.f32.mrb[3].mxu0 }
 0xbee   :  { %1312 = vtanh.f32 %v528_v23  ;;  %v1040_v26 = vmul.f32 -1.442695, %v528_v23 }
 0xbf0   :  { %1314 = vpow2.f32 %v1040_v26 }
 0xbf8   :  { %v1313_v25 = vpop.eup %1312 }
 0xbf9   :  { %538 = vrot.lane.b32.xlu0 %v1313_v25, %s1374_s1 }
 0xbfa   :  { %v1315_v27 = vpop.eup %1314 }
 0xbfb   :  { %v532_v28 = vadd.f32 1.0, %v1315_v27 }
 0xbfd   :  { %1316 = vrcp.f32 %v532_v28 }
 0xc07   :  { %v1317_v29 = vpop.eup %1316 }
 0xc08   :  { %v536_v32 = vmul.f32 %v1317_v29, %v442_v16 }
 0xc6b   :  { %v539_v30 = vpop.permute.xlu0 %538 }
 0xc6c   :  { %v541_v31 = vmul.f32 %v1317_v29, %v539_v30 }
 0xc6e   :  { %543 = vrot.lane.b32.xlu1 %v541_v31, %s1374_s1 }
 0xce0   :  { %v544_v33 = vpop.permute.xlu1 %543 }
 0xce1   :  { %v546_v34 = vadd.f32 %v544_v33, %v536_v32 }
 0xce3   :  { %1318 = vtanh.f32 %v546_v34 }
 0xced   :  { %v1319_v35 = vpop.eup %1318 }
 0xcee   :  { %549 = vrot.lane.b32.xlu0 %v1319_v35, %s1374_s1 }
 0xd60   :  { %v550_v36 = vpop.permute.xlu0 %549 }
 0xd61   :  { %v552_v37 = vmul.f32 %v1317_v29, %v550_v36 }
 0xd63   :  { %554 = vrot.lane.b32.xlu1 %v552_v37, %s1375_s11  ;;  %v767_v37 = vld [vmem:[#allocation4 + $0x38] sm:$0xff] }
 0xdd5   :  { %v555_v38 = vpop.permute.xlu1 %554 }
 0xdd6   :  { %557 = vst.msk [vmem:[#allocation2 + $0x20] sm:$0xff] %vm38_vm1, %v555_v38  ;;  %1172 = vmatmul.mubr.msk.f32.vlgmr.msra.gmra.mrb[6].mxu1 %vm38_vm1, %v555_v38 }
 0xdd7   :  { %1260 = vmatpush3.bf16.msra.mxu1 %v1431_v6  ;;  %1193 = vmatprep.mubr.msk.f32.mxu1 %vm1372_vm0, %v1373_v2 }
 0xdd8   :  { %1261 = vmatprep.subr.bf16.mxu1 %v1371_v1 }
 0xddb   :  { %1263 = vmatpush3.bf16.msra.mxu1 %v1437_v8 }
 0xddd   :  { %v874_v63 = vld [vmem:[#allocation2 + $0x20] sm:$0xff] }
 0xea9   :  { %v628_v40 = vpop.f32.mrb[6].mxu1 }
 0xeaa   :  { %v632_v41 = vadd.f32 %v628_v40, %v559_v39  ;;  %v1173_v42 = vpop.f32.mrb[7].mxu1 }
 0xeac   :  { %1320 = vtanh.f32 %v632_v41  ;;  %v1042_v44 = vmul.f32 -1.442695, %v632_v41 }
 0xeae   :  { %1322 = vpow2.f32 %v1042_v44 }
 0xeb6   :  { %v1321_v43 = vpop.eup %1320 }
 0xeb7   :  { %642 = vrot.lane.b32.xlu0 %v1321_v43, %s1374_s1 }
 0xeb8   :  { %v1323_v45 = vpop.eup %1322 }
 0xeb9   :  { %v636_v46 = vadd.f32 1.0, %v1323_v45 }
 0xebb   :  { %1324 = vrcp.f32 %v636_v46 }
 0xec5   :  { %v1325_v6 = vpop.eup %1324 }
 0xec6   :  { %v640_v1 = vmul.f32 %v1325_v6, %v546_v34 }
 0xf29   :  { %v643_v47 = vpop.permute.xlu0 %642 }
 0xf2a   :  { %v645_v2 = vmul.f32 %v1325_v6, %v643_v47 }
 0xf2c   :  { %647 = vrot.lane.b32.xlu1 %v645_v2, %s1374_s1 }
 0xf9e   :  { %v648_v8 = vpop.permute.xlu1 %647 }
 0xf9f   :  { %v1513_v48 = vadd.f32 %v648_v8, %v640_v1 }
 0xfa1   :  { %1326 = vtanh.f32 %v1513_v48 }
 0xfab   :  { %v1327_v52 = vpop.eup %1326 }
 0xfac   :  { %653 = vrot.lane.b32.xlu0 %v1327_v52, %s1374_s1 }
0x101e   :  { %v654_v53 = vpop.permute.xlu0 %653 }
0x101f   :  { %v656_v54 = vmul.f32 %v1325_v6, %v654_v53 }
0x1021   :  { %658 = vrot.lane.b32.xlu1 %v656_v54, %s1375_s11 }
0x1093   :  { %v659_v58 = vpop.permute.xlu1 %658 }
0x1094   :  { %661 = vst.msk [vmem:[#allocation2 + $0x28] sm:$0xff] %vm38_vm1, %v659_v58  ;;  %1183 = vmatmul.mubr.msk.f32.vlgmr.msra.gmra.mrb[4].mxu0 %vm38_vm1, %v659_v58 }
0x1095   :  { %1267 = vmatpush3.bf16.msra.mxu0 %v1264_v51  ;;  %1204 = vmatprep.mubr.msk.f32.mxu0 %vm38_vm1, %v870_v59 }
0x1096   :  { %1269 = vmatprep.subr.bf16.mxu0 %v1268_v57 }
0x1099   :  { %1271 = vmatpush3.bf16.msra.mxu0 %v1268_v57 }
0x109b   :  { %v875_v0 = vld [vmem:[#allocation2 + $0x28] sm:$0xff] }
0x109c   :  { %1205 = vmatmul.mubr.msk.f32.vlgmr.msra.gmra.mrb[6].mxu0 %vm38_vm1, %v871_v60 }
0x109d   :  { %1207 = vmatprep.mubr.msk.f32.mxu0 %vm38_vm1, %v872_v61 }
0x10a0   :  { %1208 = vmatmul.mubr.msk.f32.gmra.mrb[8].mxu0 %vm38_vm1, %v873_v62 }
0x10a1   :  { %1210 = vmatprep.mubr.msk.f32.mxu0 %vm38_vm1, %v874_v63 }
0x10a4   :  { %1211 = vmatmul.mubr.msk.f32.gmra.mrb[10].mxu0 %vm38_vm1, %v875_v0 }
0x1167   :  { %v732_v4 = vpop.f32.mrb[4].mxu0 }
0x1168   :  { %v736_v5 = vadd.f32 %v732_v4, %v663_v3  ;;  %v1184_v7 = vpop.f32.mrb[5].mxu0 }
0x116a   :  { %1328 = vtanh.f32 %v736_v5  ;;  %v1044_v23 = vmul.f32 -1.442695, %v736_v5 }
0x116c   :  { %1330 = vpow2.f32 %v1044_v23 }
0x116f   :  { %v1206_v10 = vpop.f32.mrb[6].mxu0 }
0x1170   :  { %v985_v11 = vadd.f32 %v1206_v10, %v1538_v9  ;;  %v979_v12 = vpop.f32.mrb[7].mxu0 }
0x1171   :  { %v980_v13 = vadd.f32 %v1538_v9, %v979_v12 }
0x1172   :  { %1020 = vst.msk [vmem:[%s1598_s4 + $0x8] sm:$0xff] %vm1018_vm2, %v985_v11 }
0x1173   :  { %1019 = vst.msk [vmem:[%s1598_s4] sm:$0xff] %vm1018_vm2, %v980_v13  ;;  %v1209_v14 = vpop.f32.mrb[8].mxu0 }
0x1174   :  { %v1329_v15 = vpop.eup %1328  ;;  %v995_v16 = vadd.f32 %v1209_v14, %v1538_v9  ;;  %v989_v17 = vpop.f32.mrb[9].mxu0 }
0x1175   :  { %v990_v18 = vadd.f32 %v1538_v9, %v989_v17  ;;  %746 = vrot.lane.b32.xlu0 %v1329_v15, %s1374_s1 }
0x1176   :  { %1022 = vst.msk [vmem:[%s1598_s4 + $0x18] sm:$0xff] %vm1018_vm2, %v995_v16  ;;  %v1331_v24 = vpop.eup %1330 }
0x1177   :  { %1021 = vst.msk [vmem:[%s1598_s4 + $0x10] sm:$0xff] %vm1018_vm2, %v990_v18  ;;  %v1212_v19 = vpop.f32.mrb[10].mxu0  ;;  %v740_v25 = vadd.f32 1.0, %v1331_v24 }
0x1178   :  { %v1005_v20 = vadd.f32 %v1212_v19, %v1538_v9  ;;  %v999_v21 = vpop.f32.mrb[11].mxu0 }
0x1179   :  { %v1000_v22 = vadd.f32 %v1538_v9, %v999_v21  ;;  %1332 = vrcp.f32 %v740_v25 }
0x117a   :  { %1024 = vst.msk [vmem:[%s1598_s4 + $0x28] sm:$0xff] %vm1018_vm2, %v1005_v20 }
0x117b   :  { %1023 = vst.msk [vmem:[%s1598_s4 + $0x20] sm:$0xff] %vm1018_vm2, %v1000_v22 }
0x1183   :  { %v1333_v26 = vpop.eup %1332 }
0x1184   :  { %v744_v29 = vmul.f32 %v1333_v26, %v1513_v48 }
0x11e7   :  { %v747_v27 = vpop.permute.xlu0 %746 }
0x11e8   :  { %v749_v28 = vmul.f32 %v1333_v26, %v747_v27 }
0x11ea   :  { %751 = vrot.lane.b32.xlu1 %v749_v28, %s1374_s1 }
0x125c   :  { %v752_v30 = vpop.permute.xlu1 %751 }
0x125d   :  { %v754_v31 = vadd.f32 %v752_v30, %v744_v29 }
0x125f   :  { %1334 = vtanh.f32 %v754_v31 }
0x1269   :  { %v1335_v32 = vpop.eup %1334 }
0x126a   :  { %757 = vrot.lane.b32.xlu0 %v1335_v32, %s1374_s1 }
0x12dc   :  { %v758_v33 = vpop.permute.xlu0 %757 }
0x12dd   :  { %v760_v34 = vmul.f32 %v1333_v26, %v758_v33 }
0x12df   :  { %762 = vrot.lane.b32.xlu1 %v760_v34, %s1375_s11 }
0x1351   :  { %v763_v35 = vpop.permute.xlu1 %762 }
0x1352   :  { %765 = vst.msk [vmem:[#allocation2 + $0x30] sm:$0xff] %vm38_vm1, %v763_v35  ;;  %1194 = vmatmul.mubr.msk.f32.vlgmr.msra.gmra.mrb[8].mxu1 %vm38_vm1, %v763_v35 }
0x1359   :  { %v876_v36 = vld [vmem:[#allocation2 + $0x30] sm:$0xff] }
0x135a   :  { %1213 = vmatprep.mubr.msk.f32.mxu0 %vm38_vm1, %v876_v36 }
0x1425   :  { %v836_v38 = vpop.f32.mrb[8].mxu1 }
0x1426   :  { %v840_v39 = vadd.f32 %v836_v38, %v767_v37  ;;  %v1195_v40 = vpop.f32.mrb[9].mxu1 }
0x1428   :  { %1336 = vtanh.f32 %v840_v39  ;;  %v1046_v42 = vmul.f32 -1.442695, %v840_v39 }
0x142a   :  { %1338 = vpow2.f32 %v1046_v42 }
0x1432   :  { %v1337_v41 = vpop.eup %1336 }
0x1433   :  { %850 = vrot.lane.b32.xlu0 %v1337_v41, %s1374_s1 }
0x1434   :  { %v1339_v43 = vpop.eup %1338 }
0x1435   :  { %v844_v44 = vadd.f32 1.0, %v1339_v43 }
0x1437   :  { %1340 = vrcp.f32 %v844_v44 }
0x1441   :  { %v1341_v45 = vpop.eup %1340 }
0x1442   :  { %v848_v47 = vmul.f32 %v1341_v45, %v754_v31 }
0x14a5   :  { %v851_v46 = vpop.permute.xlu0 %850 }
0x14a6   :  { %v853_v6 = vmul.f32 %v1341_v45, %v851_v46 }
0x14a8   :  { %855 = vrot.lane.b32.xlu1 %v853_v6, %s1374_s1 }
0x151a   :  { %v856_v2 = vpop.permute.xlu1 %855 }
0x151b   :  { %v858_v1 = vadd.f32 %v856_v2, %v848_v47 }
0x151d   :  { %1342 = vtanh.f32 %v858_v1 }
0x1527   :  { %v1343_v8 = vpop.eup %1342 }
0x1528   :  { %861 = vrot.lane.b32.xlu0 %v1343_v8, %s1374_s1 }
0x159a   :  { %v862_v48 = vpop.permute.xlu0 %861 }
0x159b   :  { %v864_v49 = vmul.f32 %v1341_v45, %v862_v48 }
0x159d   :  { %866 = vrot.lane.b32.xlu1 %v864_v49, %s1375_s11 }
0x160f   :  { %v867_v50 = vpop.permute.xlu1 %866 }
0x1610   :  { %869 = vst.msk [vmem:[#allocation2 + $0x38] sm:$0xff] %vm38_vm1, %v867_v50 }
0x1617   :  { %v877_v51 = vld [vmem:[#allocation2 + $0x38] sm:$0xff] }
0x1618   :  { %1214 = vmatmul.mubr.msk.f32.gmra.mrb[12].mxu0 %vm38_vm1, %v877_v51 }
0x16eb   :  { %v1215_v52 = vpop.f32.mrb[12].mxu0 }
0x16ec   :  { %v1015_v53 = vadd.f32 %v1215_v52, %v1538_v9  ;;  %v1009_v54 = vpop.f32.mrb[13].mxu0 }
0x16ed   :  { %v1010_v55 = vadd.f32 %v1538_v9, %v1009_v54 }
0x16ee   :  { %1026 = vst.msk [vmem:[%s1598_s4 + $0x38] sm:$0xff] %vm1018_vm2, %v1015_v53 }
0x16ef   :  { %1025 = vst.msk [vmem:[%s1598_s4 + $0x30] sm:$0xff] %vm1018_vm2, %v1010_v55 }
0x16f0   :  { %1031 = vsyncpa [#allocation5], 1 }

</bundles_post_ra>
